<compile_context>
chip_gen: v7x
topology: tpu7x:2x2x1
jax: 0.10.0
libtpu: 0.0.40
codegen_flags: <defaults>
</compile_context>

<pallas_src>
import functools

import jax
import jax.numpy as jnp
from jax.experimental import pallas as pl
from jax.experimental.pallas import tpu as pltpu


def _ata_kernel(low_ref, high_ref, p_ref, out_ref, *, hidden):
    low = low_ref[...]                                   # (bn, C, HW)
    high = high_ref[...]                                 # (bn, C, HW)
    params = p_ref[...]                                  # (C, 4*hidden + 1)

    # Static slices of the packed parameter slab (tiny, lives in ~one vreg).
    w1a = params[:, 0 * hidden:1 * hidden]               # (C, h)  1/HW folded in
    w1b = params[:, 1 * hidden:2 * hidden]               # (C, h)  1/HW folded in
    w2 = params[:, 2 * hidden:3 * hidden]                # (C, h)
    b1 = params[0:1, 3 * hidden:4 * hidden]              # (1, h)
    b2 = params[:, 4 * hidden:4 * hidden + 1]            # (C, 1)

    # Global average pool over spatial (lane reduce); the 1/HW scale is folded
    # into w1a/w1b so plain sums suffice.
    s_low = jnp.sum(low, axis=-1, keepdims=True)         # (bn, C, 1)
    s_high = jnp.sum(high, axis=-1, keepdims=True)       # (bn, C, 1)

    # fc1 + ReLU on the VPU/XLU (no lane concat, no tiny MXU dot):
    #   h1[n, j] = sum_c s_low[n,c]*w1a[c,j] + sum_c s_high[n,c]*w1b[c,j] + b1[j]
    h1 = (jnp.sum(s_low * w1a[None, :, :], axis=1)
          + jnp.sum(s_high * w1b[None, :, :], axis=1)
          + b1)                                           # (bn, h)
    h1 = jnp.maximum(h1, 0.0)

    # fc2 + sigmoid: gate[n, c] = sigmoid(sum_j w2[c,j] * h1[n,j] + b2[c])
    gate = jax.nn.sigmoid(
        jnp.sum(h1[:, None, :] * w2[None, :, :], axis=-1, keepdims=True)
        + b2[None, :, :])                                 # (bn, C, 1)

    # low * gate + high ; gate broadcasts across the lane (HW) axis.
    out_ref[...] = low * gate + high


def prepare_ata_params(w1, b1, w2, b2, hw):
    """One-time preprocessing of the tiny FC weights (hoist out of forward).

    w1 : (hidden, 2C) PyTorch nn.Linear layout (out_features, in_features)
    b1 : (hidden,)
    w2 : (C, hidden)
    b2 : (C,)
    hw : H * W of the feature maps this ATA instance is applied to.

    Returns a single (C, 4*hidden + 1) float32 slab:
      [:, 0:h]   = w1[:, :C].T / HW   (low-channel half, mean folded in)
      [:, h:2h]  = w1[:, C:].T / HW   (high-channel half, mean folded in)
      [:, 2h:3h] = w2
      [0, 3h:4h] = b1  (zeros elsewhere)
      [:, 4h]    = b2
    """
    hidden, two_c = w1.shape
    c = two_c // 2
    inv_hw = jnp.float32(1.0 / float(hw))
    w1a = (w1[:, :c].T * inv_hw).astype(jnp.float32)      # (C, h)
    w1b = (w1[:, c:].T * inv_hw).astype(jnp.float32)      # (C, h)
    b1_block = jnp.zeros((c, hidden), jnp.float32).at[0, :].set(
        b1.astype(jnp.float32))
    b2_col = b2.reshape(c, 1).astype(jnp.float32)
    return jnp.concatenate(
        [w1a, w1b, w2.astype(jnp.float32), b1_block, b2_col], axis=1)


def _choose_batch_block(n, c, hw):
    """Samples per grid step.

    Fold the whole batch into one block when each per-sample step would move
    much less than ~0.35 us (~450 KiB at v6e HBM BW) — at those sizes the grid
    is pure per-step overhead (it's a serial loop on a TC).  Large per-sample
    footprints keep grid=(N,) so v7x's two TensorCores split the batch and the
    double-buffered block stays inside VMEM.
    """
    per_sample_bytes = 3 * c * hw * 4                     # low + high + out, f32
    whole_batch_bytes = 2 * n * per_sample_bytes          # double-buffered
    if per_sample_bytes < (448 << 10) and whole_batch_bytes < (24 << 20):
        return n
    # TODO(synk): add an HW-tiled two-pass path (pool into scratch, then apply
    # gate per spatial tile) for feature maps whose per-sample block exceeds
    # the v7x/v5e scoped-VMEM budget.
    return 1


def ata_forward(low_nchw, high_nchw, packed_params):
    """ATA forward.

    low_nchw, high_nchw : (N, C, H, W) float32
    packed_params       : (C, 4*hidden + 1) slab from prepare_ata_params()
    Returns (N, C, H, W) float32.
    """
    n, c, h, w = low_nchw.shape
    hw = h * w
    k = packed_params.shape[1]
    hidden = (k - 1) // 4

    # NCHW -> (N, C, HW): pure reshape (lane-dense output, no transpose).
    low = low_nchw.reshape(n, c, hw)
    high = high_nchw.reshape(n, c, hw)

    bn = _choose_batch_block(n, c, hw)
    grid = (n // bn,)

    # VMEM budget: pipeliner double-buffers the low/high/out blocks + params.
    block_bytes = bn * c * hw * 4
    vmem_needed = 2 * (3 * block_bytes + packed_params.size * 4) + (1 << 20)
    vmem_limit = int(min(max(vmem_needed, 32 << 20), 48 << 20))

    kernel = functools.partial(_ata_kernel, hidden=hidden)

    out = pl.pallas_call(
        kernel,
        out_shape=jax.ShapeDtypeStruct((n, c, hw), jnp.float32),
        grid_spec=pltpu.PrefetchScalarGridSpec(
            num_scalar_prefetch=0,
            grid=grid,
            in_specs=[
                pl.BlockSpec((bn, c, hw), lambda i: (i, 0, 0)),   # low
                pl.BlockSpec((bn, c, hw), lambda i: (i, 0, 0)),   # high
                pl.BlockSpec((c, k), lambda i: (0, 0)),           # packed params
            ],
            out_specs=pl.BlockSpec((bn, c, hw), lambda i: (i, 0, 0)),
        ),
        # Output == high in shape/dtype; reuse its buffer (XLA copies if the
        # input is still live, so this is safe under jit).
        input_output_aliases={1: 0},
        compiler_params=pltpu.CompilerParams(
            dimension_semantics=("parallel",),
            vmem_limit_bytes=vmem_limit),
    )(low, high, packed_params)

    # (N, C, HW) -> NCHW: pure reshape.
    return out.reshape(n, c, h, w)


def _reference(low, high, w1, b1, w2, b2):
    # PyTorch-layout weights: w1 (hidden, 2C), w2 (C, hidden).
    x = jnp.concatenate([low, high], axis=1)               # (N, 2C, H, W)
    x = jnp.mean(x, axis=(2, 3))                           # (N, 2C)
    hdn = jnp.maximum(x @ w1.T + b1, 0.0)                  # (N, hidden)
    g = jax.nn.sigmoid(hdn @ w2.T + b2)                    # (N, C)
    return low * g[:, :, None, None] + high


if __name__ == "__main__":
    # Module hyper-params: ATA(inchannels=32, reduction=8).
    N, C, H, W = 2, 32, 16, 16
    REDUCTION = 8
    HIDDEN = C // REDUCTION

    key = jax.random.PRNGKey(0)
    k_low, k_high, k_w1, k_w2 = jax.random.split(key, 4)

    low_x = jax.random.normal(k_low, (N, C, H, W), dtype=jnp.float32)
    high_x = jax.random.normal(k_high, (N, C, H, W), dtype=jnp.float32)

    # nn.Linear init per init_params(): weight ~ N(0, 0.01), bias = 0.
    # PyTorch layout: (out_features, in_features).
    w1 = 0.01 * jax.random.normal(k_w1, (HIDDEN, 2 * C), dtype=jnp.float32)
    b1 = jnp.zeros((HIDDEN,), dtype=jnp.float32)
    w2 = 0.01 * jax.random.normal(k_w2, (C, HIDDEN), dtype=jnp.float32)
    b2 = jnp.zeros((C,), dtype=jnp.float32)

    # One-time weight preprocessing (hoisted out of the per-call path).
    packed = prepare_ata_params(w1, b1, w2, b2, H * W)

    fwd = jax.jit(ata_forward)
    out = fwd(low_x, high_x, packed)
    out = jax.block_until_ready(out)

    ref = _reference(low_x, high_x, w1, b1, w2, b2)
    assert out.shape == (N, C, H, W)
    assert jnp.allclose(out, ref, atol=1e-5, rtol=1e-5), "mismatch vs reference"

    print("KERNEL_OK")
</pallas_src>

<mosaic_0001>
module attributes {stable_mosaic.version = 11 : i64} {
  func.func @_ata_kernel(%arg0: i32, %arg1: memref<2x32x256xf32, #tpu.memory_space<vmem>>, %arg2: memref<2x32x256xf32, #tpu.memory_space<vmem>>, %arg3: memref<32x17xf32, #tpu.memory_space<vmem>>, %arg4: memref<2x32x256xf32, #tpu.memory_space<vmem>>) attributes {dimension_semantics = [#tpu.dimension_semantics<parallel>], iteration_bounds = array<i64: 1>, scalar_prefetch = 0 : i64, scratch_operands = 0 : i64, tpu.core_type = #tpu.core_type<tc>, window_params = [{transform_indices = @transform_0, window_bounds = array<i64: 2, 32, 256>}, {transform_indices = @transform_1, window_bounds = array<i64: 2, 32, 256>}, {pipeline_mode = #tpu.pipeline_mode<synchronous>, transform_indices = @transform_2, window_bounds = array<i64: 32, 17>}, {transform_indices = @transform_3, window_bounds = array<i64: 2, 32, 256>}]} {
    %c0 = arith.constant 0 : index
    %c0_0 = arith.constant 0 : index
    %c0_1 = arith.constant 0 : index
    %0 = vector.load %arg1[%c0, %c0_0, %c0_1] : memref<2x32x256xf32, #tpu.memory_space<vmem>>, vector<2x32x256xf32>
    %c0_2 = arith.constant 0 : index
    %c0_3 = arith.constant 0 : index
    %c0_4 = arith.constant 0 : index
    %1 = vector.load %arg2[%c0_2, %c0_3, %c0_4] : memref<2x32x256xf32, #tpu.memory_space<vmem>>, vector<2x32x256xf32>
    %c0_5 = arith.constant 0 : index
    %c0_6 = arith.constant 0 : index
    %2 = vector.load %arg3[%c0_5, %c0_6] : memref<32x17xf32, #tpu.memory_space<vmem>>, vector<32x17xf32>
    %3 = vector.extract_strided_slice %2 {offsets = [0, 0], sizes = [32, 4], strides = [1, 1]} : vector<32x17xf32> to vector<32x4xf32>
    %4 = vector.extract_strided_slice %2 {offsets = [0, 4], sizes = [32, 4], strides = [1, 1]} : vector<32x17xf32> to vector<32x4xf32>
    %5 = vector.extract_strided_slice %2 {offsets = [0, 8], sizes = [32, 4], strides = [1, 1]} : vector<32x17xf32> to vector<32x4xf32>
    %6 = vector.extract_strided_slice %2 {offsets = [0, 12], sizes = [1, 4], strides = [1, 1]} : vector<32x17xf32> to vector<1x4xf32>
    %7 = vector.extract_strided_slice %2 {offsets = [0, 16], sizes = [32, 1], strides = [1, 1]} : vector<32x17xf32> to vector<32x1xf32>
    %cst = arith.constant dense<0.000000e+00> : vector<2x32xf32>
    %8 = vector.multi_reduction <add>, %0, %cst [2] : vector<2x32x256xf32> to vector<2x32xf32>
    %9 = vector.shape_cast %8 : vector<2x32xf32> to vector<2x32x1xf32>
    %cst_7 = arith.constant dense<0.000000e+00> : vector<2x32xf32>
    %10 = vector.multi_reduction <add>, %1, %cst_7 [2] : vector<2x32x256xf32> to vector<2x32xf32>
    %11 = vector.shape_cast %10 : vector<2x32xf32> to vector<2x32x1xf32>
    %12 = vector.shape_cast %3 : vector<32x4xf32> to vector<1x32x4xf32>
    %13 = vector.broadcast %9 : vector<2x32x1xf32> to vector<2x32x4xf32>
    %14 = vector.broadcast %12 : vector<1x32x4xf32> to vector<2x32x4xf32>
    %15 = arith.mulf %13, %14 : vector<2x32x4xf32>
    %cst_8 = arith.constant dense<0.000000e+00> : vector<2x4xf32>
    %16 = vector.multi_reduction <add>, %15, %cst_8 [1] : vector<2x32x4xf32> to vector<2x4xf32>
    %17 = vector.shape_cast %4 : vector<32x4xf32> to vector<1x32x4xf32>
    %18 = vector.broadcast %11 : vector<2x32x1xf32> to vector<2x32x4xf32>
    %19 = vector.broadcast %17 : vector<1x32x4xf32> to vector<2x32x4xf32>
    %20 = arith.mulf %18, %19 : vector<2x32x4xf32>
    %cst_9 = arith.constant dense<0.000000e+00> : vector<2x4xf32>
    %21 = vector.multi_reduction <add>, %20, %cst_9 [1] : vector<2x32x4xf32> to vector<2x4xf32>
    %22 = arith.addf %16, %21 : vector<2x4xf32>
    %23 = vector.broadcast %6 : vector<1x4xf32> to vector<2x4xf32>
    %24 = arith.addf %22, %23 : vector<2x4xf32>
    %cst_10 = arith.constant 0.000000e+00 : f32
    %25 = vector.broadcast %cst_10 : f32 to vector<2x4xf32>
    %26 = arith.maximumf %24, %25 : vector<2x4xf32>
    %27 = vector.shape_cast %26 : vector<2x4xf32> to vector<2x1x4xf32>
    %28 = vector.shape_cast %5 : vector<32x4xf32> to vector<1x32x4xf32>
    %29 = vector.broadcast %27 : vector<2x1x4xf32> to vector<2x32x4xf32>
    %30 = vector.broadcast %28 : vector<1x32x4xf32> to vector<2x32x4xf32>
    %31 = arith.mulf %29, %30 : vector<2x32x4xf32>
    %cst_11 = arith.constant dense<0.000000e+00> : vector<2x32xf32>
    %32 = vector.multi_reduction <add>, %31, %cst_11 [2] : vector<2x32x4xf32> to vector<2x32xf32>
    %33 = vector.shape_cast %32 : vector<2x32xf32> to vector<2x32x1xf32>
    %34 = vector.shape_cast %7 : vector<32x1xf32> to vector<1x32x1xf32>
    %35 = vector.broadcast %34 : vector<1x32x1xf32> to vector<2x32x1xf32>
    %36 = arith.addf %33, %35 : vector<2x32x1xf32>
    %37 = arith.negf %36 : vector<2x32x1xf32>
    %38 = math.exp %37 : vector<2x32x1xf32>
    %cst_12 = arith.constant 1.000000e+00 : f32
    %39 = vector.broadcast %cst_12 : f32 to vector<2x32x1xf32>
    %40 = arith.addf %39, %38 : vector<2x32x1xf32>
    %41 = arith.divf %39, %40 : vector<2x32x1xf32>
    %42 = vector.broadcast %41 : vector<2x32x1xf32> to vector<2x32x256xf32>
    %43 = arith.mulf %0, %42 : vector<2x32x256xf32>
    %44 = arith.addf %43, %1 : vector<2x32x256xf32>
    %c0_13 = arith.constant 0 : index
    %c0_14 = arith.constant 0 : index
    %c0_15 = arith.constant 0 : index
    %45 = vector.load %arg4[%c0_13, %c0_14, %c0_15] : memref<2x32x256xf32, #tpu.memory_space<vmem>>, vector<2x32x256xf32>
    tpu.vector_store %arg4[%c0_13, %c0_14, %c0_15], %44 {strides = array<i32>} : memref<2x32x256xf32, #tpu.memory_space<vmem>>, vector<2x32x256xf32>,
    return
  }
  func.func @transform_0(%arg0: i32) -> (i32, i32, i32) {
    %c0_i32 = arith.constant 0 : i32
    %c0_i32_0 = arith.constant 0 : i32
    %c0_i32_1 = arith.constant 0 : i32
    return %arg0, %c0_i32, %c0_i32_0 : i32, i32, i32
  }
  func.func @transform_1(%arg0: i32) -> (i32, i32, i32) {
    %c0_i32 = arith.constant 0 : i32
    %c0_i32_0 = arith.constant 0 : i32
    %c0_i32_1 = arith.constant 0 : i32
    return %arg0, %c0_i32, %c0_i32_0 : i32, i32, i32
  }
  func.func @transform_2(%arg0: i32) -> (i32, i32) {
    %c0_i32 = arith.constant 0 : i32
    %c0_i32_0 = arith.constant 0 : i32
    %c0_i32_1 = arith.constant 0 : i32
    return %c0_i32, %c0_i32_0 : i32, i32
  }
  func.func @transform_3(%arg0: i32) -> (i32, i32, i32) {
    %c0_i32 = arith.constant 0 : i32
    %c0_i32_0 = arith.constant 0 : i32
    %c0_i32_1 = arith.constant 0 : i32
    return %arg0, %c0_i32, %c0_i32_0 : i32, i32, i32
  }
}

</mosaic_0001>

<bundles_post_ra>
// kernel: ata_forward.1
= control target key start
LH: loop header
LB: loop body
LE: loop exit
PB: predicated region body
PF: predicated region fallthrough
CT: control target
= control target key end

     0   :  { %v178_v48 = vlaneseq  ;;  %vm141_vm0 = vcmask 64544   ;;  %s442_s28 = smov 120   ;;  %vm106_vm1 = vcmask 31744   ;;  %s814_s1 = inlined_call_operand.vmem [shape: f32[2,32,256], index: 1, kind: input, shape index: {}, may-alias: {1,3}]   ;;  %s815_s0 = inlined_call_operand.vmem [shape: f32[2,32,256], index: 0, kind: input, shape index: {}]   ;;  %s816_s2 = inlined_call_operand.vmem [shape: f32[32,17], index: 2, kind: input, shape index: {}]   ;;  %s817_s3 = inlined_call_operand.vmem [shape: f32[2,32,256], index: 3, kind: output, shape index: {}, may-alias: {1,3}]  }
   0x1   :  { %v467_v0 = vld [vmem:[%s814_s1 + $0x40] sm:$0xff]  ;;  %v472_v1 = vld [vmem:[%s814_s1 + $0x48] sm:$0xff]  ;;  %v489_v5 = vld [vmem:[%s814_s1 + $0x50] sm:$0xff] }
   0x2   :  { %v477_v2 = vld [vmem:[%s814_s1] sm:$0xff]  ;;  %v86_v3 = vadd.f32 %v472_v1, %v467_v0  ;;  %v484_v4 = vld [vmem:[%s814_s1 + $0x8] sm:$0xff]  ;;  %v494_v6 = vld [vmem:[%s814_s1 + $0x58] sm:$0xff]  ;;  %v179_v49 = vshrl.u32 %v178_v48, 7 }
   0x3   :  { %v74_v7 = vadd.f32 %v484_v4, %v477_v2  ;;  %v501_v8 = vld [vmem:[%s814_s1 + $0x10] sm:$0xff]  ;;  %v506_v9 = vld [vmem:[%s814_s1 + $0x18] sm:$0xff]  ;;  %v89_v10 = vadd.f32 %v494_v6, %v489_v5  ;;  %v515_v12 = vld [vmem:[%s814_s1 + $0x60] sm:$0xff] }
   0x4   :  { %87 = vadd.xlane.f32.xlu1 %v86_v3  ;;  %v77_v11 = vadd.f32 %v506_v9, %v501_v8  ;;  %v520_v13 = vld [vmem:[%s814_s1 + $0x68] sm:$0xff]  ;;  %v525_v14 = vld [vmem:[%s814_s1 + $0x20] sm:$0xff]  ;;  %v539_v18 = vld [vmem:[%s814_s1 + $0x70] sm:$0xff]  ;;  %v656_v50 = vsub.s32 0, %v179_v49 }
   0x5   :  { %75 = vadd.xlane.f32.xlu0 %v74_v7  ;;  %v530_v15 = vld [vmem:[%s814_s1 + $0x28] sm:$0xff]  ;;  %v92_v16 = vadd.f32 %v520_v13, %v515_v12  ;;  %v544_v19 = vld [vmem:[%s814_s1 + $0x78] sm:$0xff]  ;;  %v549_v20 = vld [vmem:[%s814_s1 + $0x30] sm:$0xff] }
   0x6   :  { %v80_v17 = vadd.f32 %v530_v15, %v525_v14  ;;  %v554_v21 = vld [vmem:[%s814_s1 + $0x38] sm:$0xff]  ;;  %v95_v22 = vadd.f32 %v544_v19, %v539_v18  ;;  %v563_v24 = vld [vmem:[%s815_s0 + $0x10] sm:$0xff]  ;;  %v573_v26 = vld [vmem:[%s815_s0] sm:$0xff] }
   0x7   :  { %v83_v23 = vadd.f32 %v554_v21, %v549_v20  ;;  %v568_v25 = vld [vmem:[%s815_s0 + $0x18] sm:$0xff]  ;;  %v578_v27 = vld [vmem:[%s815_s0 + $0x8] sm:$0xff]  ;;  %v587_v30 = vld [vmem:[%s815_s0 + $0x50] sm:$0xff] }
   0x8   :  { %90 = vadd.xlane.f32.xlu1 %v89_v10  ;;  %v53_v28 = vadd.f32 %v568_v25, %v563_v24  ;;  %v50_v29 = vadd.f32 %v578_v27, %v573_v26  ;;  %v592_v31 = vld [vmem:[%s815_s0 + $0x58] sm:$0xff]  ;;  %v597_v32 = vld [vmem:[%s815_s0 + $0x40] sm:$0xff]  ;;  %v602_v33 = vld [vmem:[%s815_s0 + $0x48] sm:$0xff] }
   0x9   :  { %78 = vadd.xlane.f32.xlu0 %v77_v11  ;;  %v65_v34 = vadd.f32 %v592_v31, %v587_v30  ;;  %v62_v35 = vadd.f32 %v602_v33, %v597_v32  ;;  %v611_v36 = vld [vmem:[%s815_s0 + $0x60] sm:$0xff]  ;;  %v616_v37 = vld [vmem:[%s815_s0 + $0x68] sm:$0xff]  ;;  %v635_v42 = vld [vmem:[%s815_s0 + $0x70] sm:$0xff] }
   0xa   :  { %v621_v38 = vld [vmem:[%s815_s0 + $0x20] sm:$0xff]  ;;  %v626_v39 = vld [vmem:[%s815_s0 + $0x28] sm:$0xff]  ;;  %v68_v40 = vadd.f32 %v616_v37, %v611_v36  ;;  %v640_v43 = vld [vmem:[%s815_s0 + $0x78] sm:$0xff] }
   0xb   :  { %v56_v41 = vadd.f32 %v626_v39, %v621_v38  ;;  %v645_v44 = vld [vmem:[%s815_s0 + $0x30] sm:$0xff]  ;;  %v650_v45 = vld [vmem:[%s815_s0 + $0x38] sm:$0xff]  ;;  %v71_v46 = vadd.f32 %v640_v43, %v635_v42  ;;  %v661_v51 = vld [vmem:[%s816_s2] sm:$0xff]  ;;  %s440_s0 = smov 116  }
   0xc   :  { %93 = vadd.xlane.f32.xlu1 %v92_v16  ;;  %v59_v47 = vadd.f32 %v650_v45, %v645_v44  ;;  %v181_v52 = vrot.slane %v661_v51, %v656_v50  ;;  %v668_v55 = vld [vmem:[%s816_s2 + $0x8] sm:$0xff]  ;;  %v676_v61 = vld [vmem:[%s816_s2 + $0x10] sm:$0xff] }
   0xd   :  { %81 = vadd.xlane.f32.xlu0 %v80_v17 }
  0x10   :  { %96 = vadd.xlane.f32.xlu1 %v95_v22  ;;  %v687_v22 = vld [vmem:[%s816_s2 + $0x18] sm:$0xff]  ;;  %s441_s2 = smov 124  }
  0x11   :  { %84 = vadd.xlane.f32.xlu0 %v83_v23 }
  0x14   :  { %54 = vadd.xlane.f32.xlu1 %v53_v28 }
  0x15   :  { %51 = vadd.xlane.f32.xlu0 %v50_v29 }
  0x18   :  { %66 = vadd.xlane.f32.xlu1 %v65_v34 }
  0x19   :  { %63 = vadd.xlane.f32.xlu0 %v62_v35 }
  0x1c   :  { %69 = vadd.xlane.f32.xlu1 %v68_v40 }
  0x1d   :  { %57 = vadd.xlane.f32.xlu0 %v56_v41 }
  0x20   :  { %72 = vadd.xlane.f32.xlu1 %v71_v46 }
  0x21   :  { %60 = vadd.xlane.f32.xlu0 %v59_v47 }
  0x31   :  { %183 = vrot.lane.b32.xlu1 %v181_v52, %s440_s0 }
  0x91   :  { %v88_v53 = vpop.xlane.xlu1 %87 }
  0x92   :  { %v76_v54 = vpop.xlane.xlu0 %75  ;;  %v137_v57 = vmul.f32 %v88_v53, %v661_v51 }
  0x93   :  { %v133_v62 = vmul.f32 %v76_v54, %v661_v51 }
  0x94   :  { %v155_v3 = vsel %vm141_vm0, %v137_v57, 0.0 }
  0x95   :  { %v91_v56 = vpop.xlane.xlu1 %90  ;;  %v142_v28 = vsel %vm141_vm0, %v133_v62, 0.0 }
  0x96   :  { %v138_v58 = vmul.f32 %v91_v56, %v668_v55  ;;  %v79_v59 = vpop.xlane.xlu0 %78 }
  0x97   :  { %v134_v60 = vmul.f32 %v79_v59, %v668_v55 }
  0x98   :  { %v156_v7 = vsel %vm141_vm0, %v138_v58, 0.0 }
  0x99   :  { %v94_v63 = vpop.xlane.xlu1 %93  ;;  %v143_v16 = vsel %vm141_vm0, %v134_v60, 0.0  ;;  %v157_v29 = vadd.f32 %v156_v7, %v155_v3 }
  0x9a   :  { %v139_v10 = vmul.f32 %v94_v63, %v676_v61  ;;  %v82_v11 = vpop.xlane.xlu0 %81  ;;  %v144_v40 = vadd.f32 %v143_v16, %v142_v28 }
  0x9b   :  { %v135_v17 = vmul.f32 %v82_v11, %v676_v61 }
  0x9c   :  { %v158_v23 = vsel %vm141_vm0, %v139_v10, 0.0 }
  0x9d   :  { %v145_v34 = vsel %vm141_vm0, %v135_v17, 0.0  ;;  %v97_v35 = vpop.xlane.xlu1 %96  ;;  %v159_v47 = vadd.f32 %v158_v23, %v157_v29 }
  0x9e   :  { %v140_v41 = vmul.f32 %v97_v35, %v687_v22  ;;  %v85_v46 = vpop.xlane.xlu0 %84  ;;  %v146_v49 = vadd.f32 %v145_v34, %v144_v40 }
  0x9f   :  { %v136_v48 = vmul.f32 %v85_v46, %v687_v22 }
  0xa0   :  { %v160_v52 = vsel %vm141_vm0, %v140_v41, 0.0 }
  0xa1   :  { %v161_v53 = vadd.f32 %v160_v52, %v159_v47  ;;  %v147_v54 = vsel %vm141_vm0, %v136_v48, 0.0  ;;  %v55_v23 = vpop.xlane.xlu1 %54 }
  0xa2   :  { %v148_v56 = vadd.f32 %v147_v54, %v146_v49  ;;  %v52_v28 = vpop.xlane.xlu0 %51  ;;  %v99_v48 = vmul.f32 %v55_v23, %v668_v55 }
  0xa3   :  { %v162_v57 = vrot.slane %v161_v53, 4  ;;  %v98_v47 = vmul.f32 %v52_v28, %v661_v51 }
  0xa4   :  { %v149_v58 = vrot.slane %v148_v56, 4 }
  0xa5   :  { %v163_v59 = vadd.f32 %v162_v57, %v161_v53  ;;  %v67_v29 = vpop.xlane.xlu1 %66  ;;  %v107_v54 = vsel %vm106_vm1, %v98_v47, 0.0 }
  0xa6   :  { %v150_v60 = vadd.f32 %v149_v58, %v148_v56  ;;  %v64_v34 = vpop.xlane.xlu0 %63  ;;  %v103_v41 = vmul.f32 %v67_v29, %v668_v55  ;;  %v108_v56 = vsel %vm106_vm1, %v99_v48, 0.0 }
  0xa7   :  { %v164_v62 = vrot.slane %v163_v59, 2  ;;  %v102_v40 = vmul.f32 %v64_v34, %v661_v51 }
  0xa8   :  { %v151_v63 = vrot.slane %v150_v60, 2  ;;  %v121_v52 = vsel %vm106_vm1, %v103_v41, 0.0 }
  0xa9   :  { %v165_v3 = vadd.f32 %v164_v62, %v163_v59  ;;  %v70_v35 = vpop.xlane.xlu1 %69  ;;  %v120_v49 = vsel %vm106_vm1, %v102_v40, 0.0  ;;  %v109_v62 = vadd.f32 %v108_v56, %v107_v54 }
  0xaa   :  { %v152_v7 = vadd.f32 %v151_v63, %v150_v60  ;;  %v58_v46 = vpop.xlane.xlu0 %57  ;;  %v104_v53 = vmul.f32 %v70_v35, %v676_v61  ;;  %v122_v60 = vadd.f32 %v121_v52, %v120_v49 }
  0xab   :  { %v166_v10 = vrot.slane %v165_v3, 1  ;;  %v100_v57 = vmul.f32 %v58_v46, %v676_v61 }
  0xac   :  { %v153_v11 = vrot.slane %v152_v7, 1  ;;  %v123_v63 = vsel %vm106_vm1, %v104_v53, 0.0 }
  0xad   :  { %v167_v16 = vadd.f32 %v166_v10, %v165_v3  ;;  %v73_v58 = vpop.xlane.xlu1 %72 }
  0xae   :  { %v154_v17 = vadd.f32 %v153_v11, %v152_v7  ;;  %v61_v59 = vpop.xlane.xlu0 %60  ;;  %v105_v3 = vmul.f32 %v73_v58, %v687_v22  ;;  %v110_v7 = vsel %vm106_vm1, %v100_v57, 0.0  ;;  %v124_v11 = vadd.f32 %v123_v63, %v122_v60 }
  0xaf   :  { %172 = vrot.lane.b32.xlu1 %v167_v16, %s441_s2  ;;  %v101_v10 = vmul.f32 %v61_v59, %v687_v22  ;;  %v111_v16 = vadd.f32 %v110_v7, %v109_v62 }
  0xb0   :  { %170 = vrot.lane.b32.xlu0 %v154_v17, %s441_s2  ;;  %v125_v17 = vsel %vm106_vm1, %v105_v3, 0.0 }
  0xb1   :  { %v112_v23 = vsel %vm106_vm1, %v101_v10, 0.0  ;;  %v126_v28 = vadd.f32 %v125_v17, %v124_v11  ;;  %v184_v52 = vpop.permute.xlu1 %183 }
  0xb2   :  { %v113_v29 = vadd.f32 %v112_v23, %v111_v16 }
  0xb3   :  { %202 = vrot.lane.b32.xlu1 %v661_v51, %s442_s28  ;;  %v127_v34 = vrot.slane %v126_v28, 4 }
  0xb4   :  { %204 = vrot.lane.b32.xlu0 %v668_v55, %s442_s28  ;;  %v114_v35 = vrot.slane %v113_v29, 4 }
  0xb5   :  { %v128_v40 = vadd.f32 %v127_v34, %v126_v28 }
  0xb6   :  { %v115_v41 = vadd.f32 %v114_v35, %v113_v29 }
  0xb7   :  { %206 = vrot.lane.b32.xlu1 %v676_v61, %s442_s28  ;;  %v129_v46 = vrot.slane %v128_v40, 2 }
  0xb8   :  { %208 = vrot.lane.b32.xlu0 %v687_v22, %s442_s28  ;;  %v116_v47 = vrot.slane %v115_v41, 2 }
  0xb9   :  { %v130_v48 = vadd.f32 %v129_v46, %v128_v40 }
  0xba   :  { %v117_v49 = vadd.f32 %v116_v47, %v115_v41 }
  0xbb   :  { %v131_v53 = vrot.slane %v130_v48, 1 }
  0xbc   :  { %v118_v54 = vrot.slane %v117_v49, 1 }
  0xbd   :  { %v132_v56 = vadd.f32 %v131_v53, %v130_v48 }
  0xbe   :  { %v119_v58 = vadd.f32 %v118_v54, %v117_v49 }
 0x121   :  { %v173_v57 = vpop.permute.xlu1 %172 }
 0x122   :  { %v177_v59 = vadd.f32 %v173_v57, %v132_v56  ;;  %v171_v60 = vpop.permute.xlu0 %170 }
 0x123   :  { %v176_v62 = vadd.f32 %v171_v60, %v119_v58  ;;  %v443_v60 = vmov 16  }
 0x124   :  { %v187_v63 = vadd.f32 %v184_v52, %v177_v59  ;;  %407 = vset.pattern.permute.xlu0 %v443_v60  ;;  %406 = vset.pattern.permute.xlu1 %v443_v60 }
 0x125   :  { %v186_v3 = vadd.f32 %v184_v52, %v176_v62  ;;  %v203_v7 = vpop.permute.xlu1 %202 }
 0x126   :  { %v189_v10 = vmax.f32 %v187_v63, 0.0  ;;  %v205_v16 = vpop.permute.xlu0 %204 }
 0x127   :  { %v188_v11 = vmax.f32 %v186_v3, 0.0 }
 0x128   :  { %v197_v17 = vrot.slane %v189_v10, %v656_v50 }
 0x129   :  { %v193_v23 = vrot.slane %v188_v11, %v656_v50  ;;  %v207_v28 = vpop.permute.xlu1 %206 }
 0x12a   :  { %v218_v35 = vmul.f32 %v203_v7, %v197_v17  ;;  %v209_v47 = vpop.permute.xlu0 %208  ;;  %v220_v48 = vmul.f32 %v207_v28, %v197_v17  ;;  %v219_v50 = vmul.f32 %v205_v16, %v197_v17 }
 0x12b   :  { %v214_v29 = vmul.f32 %v203_v7, %v193_v23  ;;  %v215_v34 = vmul.f32 %v205_v16, %v193_v23  ;;  %v216_v40 = vmul.f32 %v207_v28, %v193_v23  ;;  %v217_v49 = vmul.f32 %v209_v47, %v193_v23 }
 0x12c   :  { %v234_v52 = vsel %vm106_vm1, %v218_v35, 0.0  ;;  %v240_v54 = vsel %vm106_vm1, %v220_v48, 0.0  ;;  %v221_v57 = vmul.f32 %v209_v47, %v197_v17  ;;  %v237_v58 = vsel %vm106_vm1, %v219_v50, 0.0 }
 0x12d   :  { %v222_v41 = vsel %vm106_vm1, %v214_v29, 0.0  ;;  %v225_v46 = vsel %vm106_vm1, %v215_v34, 0.0  ;;  %v228_v53 = vsel %vm106_vm1, %v216_v40, 0.0  ;;  %v231_v56 = vsel %vm106_vm1, %v217_v49, 0.0 }
 0x12e   :  { %223 = vadd.xlane.f32.xlu1 %v222_v41  ;;  %226 = vadd.xlane.f32.xlu0 %v225_v46  ;;  %v243_v59 = vsel %vm106_vm1, %v221_v57, 0.0 }
 0x132   :  { %235 = vadd.xlane.f32.xlu1 %v234_v52  ;;  %229 = vadd.xlane.f32.xlu0 %v228_v53 }
 0x136   :  { %241 = vadd.xlane.f32.xlu1 %v240_v54  ;;  %232 = vadd.xlane.f32.xlu0 %v231_v56 }
 0x13a   :  { %238 = vadd.xlane.f32.xlu0 %v237_v58 }
 0x13e   :  { %244 = vadd.xlane.f32.xlu0 %v243_v59 }
 0x1bb   :  { %v224_v62 = vpop.xlane.xlu1 %223  ;;  %v227_v63 = vpop.xlane.xlu0 %226 }
 0x1bc   :  { %v246_v3 = vadd.f32 %v224_v62, %v661_v51  ;;  %v247_v7 = vadd.f32 %v227_v63, %v668_v55 }
 0x1be   :  { %v394_v10 = vmul.f32 -1.442695, %v246_v3  ;;  %v395_v11 = vmul.f32 -1.442695, %v247_v7 }
 0x1bf   :  { %v236_v16 = vpop.xlane.xlu1 %235  ;;  %v230_v23 = vpop.xlane.xlu0 %229 }
 0x1c0   :  { %408 = vpow2.f32 %v394_v10  ;;  %v250_v17 = vadd.f32 %v236_v16, %v661_v51  ;;  %v248_v28 = vadd.f32 %v230_v23, %v676_v61 }
 0x1c1   :  { %410 = vpow2.f32 %v395_v11 }
 0x1c2   :  { %v396_v29 = vmul.f32 -1.442695, %v248_v28  ;;  %v398_v35 = vmul.f32 -1.442695, %v250_v17 }
 0x1c3   :  { %v233_v34 = vpop.xlane.xlu0 %232  ;;  %v242_v41 = vpop.xlane.xlu1 %241 }
 0x1c4   :  { %v249_v40 = vadd.f32 %v233_v34, %v687_v22  ;;  %412 = vpow2.f32 %v396_v29  ;;  %v252_v49 = vadd.f32 %v242_v41, %v676_v61 }
 0x1c5   :  { %414 = vpow2.f32 %v398_v35 }
 0x1c6   :  { %v397_v46 = vmul.f32 -1.442695, %v249_v40  ;;  %v400_v57 = vmul.f32 -1.442695, %v252_v49 }
 0x1c7   :  { %v239_v47 = vpop.xlane.xlu0 %238 }
 0x1c8   :  { %v251_v48 = vadd.f32 %v239_v47, %v668_v55  ;;  %416 = vpow2.f32 %v397_v46 }
 0x1ca   :  { %v409_v52 = vpop.eup %408  ;;  %v399_v51 = vmul.f32 -1.442695, %v251_v48 }
 0x1cb   :  { %v411_v53 = vpop.eup %410  ;;  %v278_v50 = vadd.f32 1.0, %v409_v52  ;;  %v245_v54 = vpop.xlane.xlu0 %244 }
 0x1cc   :  { %v279_v56 = vadd.f32 1.0, %v411_v53  ;;  %418 = vpow2.f32 %v399_v51  ;;  %v253_v58 = vadd.f32 %v245_v54, %v687_v22 }
 0x1cd   :  { %420 = vrcp.f32 %v278_v50 }
 0x1ce   :  { %422 = vrcp.f32 %v279_v56  ;;  %v413_v59 = vpop.eup %412  ;;  %v401_v62 = vmul.f32 -1.442695, %v253_v58 }
 0x1cf   :  { %v280_v60 = vadd.f32 1.0, %v413_v59  ;;  %424 = vpow2.f32 %v400_v57  ;;  %v415_v55 = vpop.eup %414 }
 0x1d0   :  { %v282_v7 = vadd.f32 1.0, %v415_v55 }
 0x1d1   :  { %426 = vrcp.f32 %v280_v60 }
 0x1d2   :  { %v417_v61 = vpop.eup %416  ;;  %428 = vpow2.f32 %v401_v62 }
 0x1d3   :  { %v281_v63 = vadd.f32 1.0, %v417_v61 }
 0x1d5   :  { %430 = vrcp.f32 %v281_v63 }
 0x1d6   :  { %v419_v3 = vpop.eup %418  ;;  %432 = vrcp.f32 %v282_v7 }
 0x1d7   :  { %v421_v10 = vpop.eup %420  ;;  %v283_v16 = vadd.f32 1.0, %v419_v3 }
 0x1d8   :  { %v423_v11 = vpop.eup %422  ;;  %304 = vperm.xlu1 %406, %v421_v10  }
 0x1d9   :  { %309 = vperm.xlu0 %407, %v423_v11   ;;  %v425_v22 = vpop.eup %424  ;;  %434 = vrcp.f32 %v283_v16 }
 0x1da   :  { %v284_v17 = vadd.f32 1.0, %v425_v22 }
 0x1db   :  { %v427_v23 = vpop.eup %426 }
 0x1dc   :  { %314 = vperm.xlu1 %406, %v427_v23   ;;  %v429_v28 = vpop.eup %428  ;;  %436 = vrcp.f32 %v284_v17 }
 0x1dd   :  { %v285_v34 = vadd.f32 1.0, %v429_v28 }
 0x1df   :  { %v431_v29 = vpop.eup %430  ;;  %438 = vrcp.f32 %v285_v34 }
 0x1e0   :  { %319 = vperm.xlu1 %406, %v431_v29   ;;  %v433_v35 = vpop.eup %432 }
 0x1e3   :  { %v435_v40 = vpop.eup %434 }
 0x1e4   :  { %324 = vperm.xlu1 %406, %v433_v35  }
 0x1e6   :  { %v437_v41 = vpop.eup %436 }
 0x1e8   :  { %329 = vperm.xlu1 %406, %v435_v40  }
 0x1e9   :  { %v439_v46 = vpop.eup %438 }
 0x1ec   :  { %334 = vperm.xlu1 %406, %v437_v41  }
 0x1f0   :  { %339 = vperm.xlu1 %406, %v439_v46  }
 0x257   :  { %v305_v47 = vpop.permute.xlu1 %304 }
 0x258   :  { %v342_v48 = vmul.f32 %v305_v47, %v573_v26  ;;  %v343_v49 = vmul.f32 %v305_v47, %v578_v27  ;;  %v310_v52 = vpop.permute.xlu0 %309 }
 0x259   :  { %v344_v51 = vmul.f32 %v310_v52, %v563_v24  ;;  %v345_v53 = vmul.f32 %v310_v52, %v568_v25 }
 0x25a   :  { %v358_v50 = vadd.f32 %v342_v48, %v477_v2  ;;  %v359_v54 = vadd.f32 %v343_v49, %v484_v4 }
 0x25b   :  { %v360_v56 = vadd.f32 %v344_v51, %v501_v8  ;;  %v361_v57 = vadd.f32 %v345_v53, %v506_v9  ;;  %v315_v26 = vpop.permute.xlu1 %314 }
 0x25c   :  { %374 = vst [vmem:[%s817_s3] sm:$0xff] %v358_v50  ;;  %375 = vst [vmem:[%s817_s3 + $0x8] sm:$0xff] %v359_v54  ;;  %v346_v2 = vmul.f32 %v315_v26, %v621_v38  ;;  %v347_v4 = vmul.f32 %v315_v26, %v626_v39 }
 0x25d   :  { %376 = vst [vmem:[%s817_s3 + $0x10] sm:$0xff] %v360_v56  ;;  %377 = vst [vmem:[%s817_s3 + $0x18] sm:$0xff] %v361_v57 }
 0x25e   :  { %v362_v8 = vadd.f32 %v346_v2, %v525_v14  ;;  %v363_v9 = vadd.f32 %v347_v4, %v530_v15 }
 0x25f   :  { %v320_v24 = vpop.permute.xlu1 %319 }
 0x260   :  { %378 = vst [vmem:[%s817_s3 + $0x20] sm:$0xff] %v362_v8  ;;  %379 = vst [vmem:[%s817_s3 + $0x28] sm:$0xff] %v363_v9  ;;  %v348_v25 = vmul.f32 %v320_v24, %v645_v44  ;;  %v349_v27 = vmul.f32 %v320_v24, %v650_v45 }
 0x262   :  { %v364_v38 = vadd.f32 %v348_v25, %v549_v20  ;;  %v365_v39 = vadd.f32 %v349_v27, %v554_v21 }
 0x263   :  { %v325_v14 = vpop.permute.xlu1 %324 }
 0x264   :  { %380 = vst [vmem:[%s817_s3 + $0x30] sm:$0xff] %v364_v38  ;;  %381 = vst [vmem:[%s817_s3 + $0x38] sm:$0xff] %v365_v39  ;;  %v350_v15 = vmul.f32 %v325_v14, %v597_v32  ;;  %v351_v58 = vmul.f32 %v325_v14, %v602_v33 }
 0x266   :  { %v366_v44 = vadd.f32 %v350_v15, %v467_v0  ;;  %v367_v45 = vadd.f32 %v351_v58, %v472_v1 }
 0x267   :  { %v330_v20 = vpop.permute.xlu1 %329 }
 0x268   :  { %382 = vst [vmem:[%s817_s3 + $0x40] sm:$0xff] %v366_v44  ;;  %383 = vst [vmem:[%s817_s3 + $0x48] sm:$0xff] %v367_v45  ;;  %v352_v21 = vmul.f32 %v330_v20, %v587_v30  ;;  %v353_v59 = vmul.f32 %v330_v20, %v592_v31 }
 0x26a   :  { %v368_v32 = vadd.f32 %v352_v21, %v489_v5  ;;  %v369_v33 = vadd.f32 %v353_v59, %v494_v6 }
 0x26b   :  { %v335_v0 = vpop.permute.xlu1 %334 }
 0x26c   :  { %384 = vst [vmem:[%s817_s3 + $0x50] sm:$0xff] %v368_v32  ;;  %385 = vst [vmem:[%s817_s3 + $0x58] sm:$0xff] %v369_v33  ;;  %v354_v1 = vmul.f32 %v335_v0, %v611_v36  ;;  %v355_v60 = vmul.f32 %v335_v0, %v616_v37 }
 0x26e   :  { %v370_v30 = vadd.f32 %v354_v1, %v515_v12  ;;  %v371_v31 = vadd.f32 %v355_v60, %v520_v13 }
 0x26f   :  { %v340_v5 = vpop.permute.xlu1 %339 }
 0x270   :  { %386 = vst [vmem:[%s817_s3 + $0x60] sm:$0xff] %v370_v30  ;;  %387 = vst [vmem:[%s817_s3 + $0x68] sm:$0xff] %v371_v31  ;;  %v356_v6 = vmul.f32 %v340_v5, %v635_v42  ;;  %v357_v62 = vmul.f32 %v340_v5, %v640_v43 }
 0x272   :  { %v372_v36 = vadd.f32 %v356_v6, %v539_v18  ;;  %v373_v37 = vadd.f32 %v357_v62, %v544_v19 }
 0x274   :  { %388 = vst [vmem:[%s817_s3 + $0x70] sm:$0xff] %v372_v36  ;;  %389 = vst [vmem:[%s817_s3 + $0x78] sm:$0xff] %v373_v37 }

</bundles_post_ra>
